<compile_context>
chip_gen: v7x
topology: tpu7x:2x2x1
jax: 0.10.0
libtpu: 0.0.40
codegen_flags: <defaults>
</compile_context>

<pallas_src>
import functools

import jax
import jax.numpy as jnp
from jax.experimental import pallas as pl
from jax.experimental.pallas import tpu as pltpu

# ----------------------------- demo config ----------------------------------
HIDDEN_SIZE = 128          # D  (multiple of 128 -> lane-dense tiles)
INTERMEDIATE_SIZE = 512    # I
SEQ_LEN = 256              # T  (tokens)
DTYPE = jnp.float32        # activation dtype
WEIGHT_DTYPE = jnp.bfloat16


# ----------------------------- tile selection --------------------------------
def _hardware_defaults():
    """(tm_target, ti_target, vmem_limit_bytes) per TPU generation."""
    kind = ""
    try:
        kind = jax.devices()[0].device_kind.lower()
    except Exception:  # pragma: no cover - defensive
        pass
    if "v7" in kind:
        # 64 MiB physical VMEM per TensorCore -> leave headroom.
        return 256, 256, 48 * 1024 * 1024
    if "v6" in kind or "v5" in kind:
        # 128 MiB physical VMEM -> big tiles, amortize weight streaming.
        return 512, 512, 96 * 1024 * 1024
    # Unknown / fallback: conservative.
    return 256, 256, 48 * 1024 * 1024


def _largest_tile(total: int, target: int, quantum: int) -> int:
    """Largest multiple of `quantum` that divides `total` and is <= target."""
    target = min(target, total)
    t = (target // quantum) * quantum
    while t >= quantum:
        if total % t == 0:
            return t
        t -= quantum
    return total  # fall back to the full dimension


def _pick_tm(T: int, target: int) -> int:
    # Keep >= 2 token tiles when possible so the 'parallel' axis can shard
    # across both TensorCores (v7x megacore).
    if T >= 256:
        target = min(target, T // 2)
    quantum = 128 if T % 128 == 0 else 8
    return _largest_tile(T, target, quantum)


# ----------------------------- fused MLP kernel -----------------------------
def _fused_mlp_kernel(x_ref, wgu_ref, wd_ref, o_ref, *, ti: int):
    """One (token-tile, intermediate-tile) step of the fused MLP.

    x_ref  : [tm, D]      bf16 activation tile (resident across reduction axis)
    wgu_ref: [D, 2*ti]    packed gate|up weight tile (bf16)
    wd_ref : [ti, D]      down_proj weight tile (bf16)
    o_ref  : [tm, D]      f32 output tile, doubles as the accumulator
                          (resident across the reduction axis).
    """
    j = pl.program_id(1)

    # One fused gate+up GEMM; split at the (128-aligned) ti boundary.
    gu = jnp.dot(x_ref[...], wgu_ref[...],
                 preferred_element_type=jnp.float32)        # [tm, 2*ti] f32
    gate = gu[:, :ti]
    up = gu[:, ti:]

    # SiLU(gate) * up in f32 (logistic lands on the EUP slot).
    h = gate * jax.lax.logistic(gate) * up                   # [tm, ti] f32

    # Partial down_proj contribution for this intermediate slice,
    # accumulated directly into the VMEM-resident f32 output tile.
    partial = jnp.dot(h.astype(jnp.bfloat16), wd_ref[...],
                      preferred_element_type=jnp.float32)    # [tm, D] f32

    @pl.when(j == 0)
    def _first():
        o_ref[...] = partial

    @pl.when(j > 0)
    def _rest():
        o_ref[...] += partial


def baichuan_mlp(x: jnp.ndarray,
                 w_gate: jnp.ndarray,
                 w_up: jnp.ndarray,
                 w_down: jnp.ndarray,
                 *,
                 tm: int | None = None,
                 ti: int | None = None,
                 vmem_limit_bytes: int | None = None) -> jnp.ndarray:
    """Fused BaichuanMLP forward.

    x      : [T, D]  activations
    w_gate : [D, I]  gate_proj weight, pre-transposed ([in, out])
    w_up   : [D, I]  up_proj   weight, pre-transposed
    w_down : [I, D]  down_proj weight, pre-transposed
    returns: [T, D]  in x.dtype
    """
    T, D = x.shape
    D2, I = w_gate.shape
    assert D == D2 and w_up.shape == (D, I) and w_down.shape == (I, D)
    assert D % 128 == 0, "hidden size must be lane-dense (multiple of 128)"
    assert I % 128 == 0, "intermediate size must be a multiple of 128"
    assert T % 8 == 0, "token count must be a multiple of 8 (sublane)"

    tm_t, ti_t, vmem_t = _hardware_defaults()
    tm = tm if tm is not None else _pick_tm(T, tm_t)
    ti = ti if ti is not None else _largest_tile(I, ti_t, 128)
    vmem_limit_bytes = vmem_limit_bytes if vmem_limit_bytes is not None else vmem_t
    assert T % tm == 0 and I % ti == 0

    # bf16 MXU operands: pre-cast once in the wrapper (halves DMA bytes and
    # removes per-reduction-step in-kernel casts).
    x_bf16 = x.astype(jnp.bfloat16)
    wd_bf16 = w_down.astype(jnp.bfloat16)

    # Pack gate|up tile-interleaved along the output axis so a (D, 2*ti) block
    # at block index j holds gate[:, j*ti:(j+1)*ti] and up[:, j*ti:(j+1)*ti].
    # TODO(synk): in production, do this packing once at weight-load time.
    nt = I // ti
    w_gu = jnp.concatenate(
        [w_gate.astype(jnp.bfloat16).reshape(D, nt, ti),
         w_up.astype(jnp.bfloat16).reshape(D, nt, ti)],
        axis=-1).reshape(D, 2 * I)

    grid = (T // tm, I // ti)

    out_f32 = pl.pallas_call(
        functools.partial(_fused_mlp_kernel, ti=ti),
        out_shape=jax.ShapeDtypeStruct((T, D), jnp.float32),
        grid_spec=pltpu.PrefetchScalarGridSpec(
            num_scalar_prefetch=0,
            grid=grid,
            in_specs=[
                # x tile: resident across the whole reduction axis.
                pl.BlockSpec((tm, D), lambda i, j: (i, 0)),
                # packed gate|up weight slice: streams along reduction axis.
                pl.BlockSpec((D, 2 * ti), lambda i, j: (0, j)),
                # down_proj weight slice.
                pl.BlockSpec((ti, D), lambda i, j: (j, 0)),
            ],
            # Output tile is resident across the reduction axis and doubles
            # as the f32 accumulator (no separate scratch).
            out_specs=pl.BlockSpec((tm, D), lambda i, j: (i, 0)),
        ),
        compiler_params=pltpu.CompilerParams(
            dimension_semantics=("parallel", "arbitrary"),
            vmem_limit_bytes=vmem_limit_bytes,
        ),
    )(x_bf16, w_gu, wd_bf16)

    return out_f32.astype(x.dtype)


# ----------------------------- reference (pure JAX) --------------------------
def mlp_reference(x, w_gate, w_up, w_down):
    x_bf16 = x.astype(jnp.bfloat16)
    gate = jnp.dot(x_bf16, w_gate.astype(jnp.bfloat16),
                   preferred_element_type=jnp.float32)
    up = jnp.dot(x_bf16, w_up.astype(jnp.bfloat16),
                 preferred_element_type=jnp.float32)
    h = gate * jax.lax.logistic(gate) * up
    return jnp.dot(h.astype(jnp.bfloat16), w_down.astype(jnp.bfloat16),
                   preferred_element_type=jnp.float32).astype(x.dtype)


# ----------------------------- main ------------------------------------------
if __name__ == "__main__":
    key = jax.random.PRNGKey(0)
    kx, kg, ku, kd = jax.random.split(key, 4)

    x = jax.random.normal(kx, (SEQ_LEN, HIDDEN_SIZE), dtype=DTYPE)
    # Weights stored pre-transposed ([in, out]) and pre-cast to bf16.
    w_gate = (0.02 * jax.random.normal(
        kg, (HIDDEN_SIZE, INTERMEDIATE_SIZE), dtype=jnp.float32)
              ).astype(WEIGHT_DTYPE)
    w_up = (0.02 * jax.random.normal(
        ku, (HIDDEN_SIZE, INTERMEDIATE_SIZE), dtype=jnp.float32)
            ).astype(WEIGHT_DTYPE)
    w_down = (0.02 * jax.random.normal(
        kd, (INTERMEDIATE_SIZE, HIDDEN_SIZE), dtype=jnp.float32)
              ).astype(WEIGHT_DTYPE)

    fwd = jax.jit(baichuan_mlp)
    out = fwd(x, w_gate, w_up, w_down)
    jax.block_until_ready(out)

    ref = mlp_reference(x, w_gate, w_up, w_down)
    jax.block_until_ready(ref)

    assert out.shape == (SEQ_LEN, HIDDEN_SIZE)
    assert jnp.isfinite(out).all()
    assert jnp.allclose(out, ref, rtol=1e-3, atol=1e-4), (
        float(jnp.max(jnp.abs(out - ref))))
    print("KERNEL_OK")
</pallas_src>

<mosaic_0001>
module attributes {stable_mosaic.version = 11 : i64} {
  func.func @_fused_mlp_kernel(%arg0: i32, %arg1: i32, %arg2: memref<128x128xbf16, #tpu.memory_space<vmem>>, %arg3: memref<128x512xbf16, #tpu.memory_space<vmem>>, %arg4: memref<256x128xbf16, #tpu.memory_space<vmem>>, %arg5: memref<128x128xf32, #tpu.memory_space<vmem>>) attributes {dimension_semantics = [#tpu.dimension_semantics<parallel>, #tpu.dimension_semantics<arbitrary>], iteration_bounds = array<i64: 2, 2>, scalar_prefetch = 0 : i64, scratch_operands = 0 : i64, tpu.core_type = #tpu.core_type<tc>, window_params = [{transform_indices = @transform_0, window_bounds = array<i64: 128, 128>}, {transform_indices = @transform_1, window_bounds = array<i64: 128, 512>}, {transform_indices = @transform_2, window_bounds = array<i64: 256, 128>}, {transform_indices = @transform_3, window_bounds = array<i64: 128, 128>}]} {
    %c0 = arith.constant 0 : index
    %c0_0 = arith.constant 0 : index
    %0 = vector.load %arg2[%c0, %c0_0] : memref<128x128xbf16, #tpu.memory_space<vmem>>, vector<128x128xbf16>
    %c0_1 = arith.constant 0 : index
    %c0_2 = arith.constant 0 : index
    %1 = vector.load %arg3[%c0_1, %c0_2] : memref<128x512xbf16, #tpu.memory_space<vmem>>, vector<128x512xbf16>
    %cst = arith.constant dense<0.000000e+00> : vector<128x512xf32>
    %2 = tpu.matmul %0, %1, %cst {dimension_numbers = #tpu.dot_dimension_numbers<[1], [0], [0], [1], [0, 0, 1, 1], [], []>} : vector<128x128xbf16>, vector<128x512xbf16>, vector<128x512xf32> -> vector<128x512xf32>
    %3 = vector.extract_strided_slice %2 {offsets = [0, 0], sizes = [128, 256], strides = [1, 1]} : vector<128x512xf32> to vector<128x256xf32>
    %4 = vector.extract_strided_slice %2 {offsets = [0, 256], sizes = [128, 256], strides = [1, 1]} : vector<128x512xf32> to vector<128x256xf32>
    %5 = arith.negf %3 : vector<128x256xf32>
    %6 = math.exp %5 : vector<128x256xf32>
    %cst_3 = arith.constant 1.000000e+00 : f32
    %7 = vector.broadcast %cst_3 : f32 to vector<128x256xf32>
    %8 = arith.addf %7, %6 : vector<128x256xf32>
    %9 = arith.divf %7, %8 : vector<128x256xf32>
    %10 = arith.mulf %3, %9 : vector<128x256xf32>
    %11 = arith.mulf %10, %4 : vector<128x256xf32>
    %12 = arith.truncf %11 : vector<128x256xf32> to vector<128x256xbf16>
    %c0_4 = arith.constant 0 : index
    %c0_5 = arith.constant 0 : index
    %13 = vector.load %arg4[%c0_4, %c0_5] : memref<256x128xbf16, #tpu.memory_space<vmem>>, vector<256x128xbf16>
    %cst_6 = arith.constant dense<0.000000e+00> : vector<128x128xf32>
    %14 = tpu.matmul %12, %13, %cst_6 {dimension_numbers = #tpu.dot_dimension_numbers<[1], [0], [0], [1], [0, 0, 1, 1], [], []>} : vector<128x256xbf16>, vector<256x128xbf16>, vector<128x128xf32> -> vector<128x128xf32>
    %c0_i32 = arith.constant 0 : i32
    %15 = arith.cmpi eq, %arg1, %c0_i32 : i32
    %16 = arith.extui %15 : i1 to i32
    %c0_i32_7 = arith.constant 0 : i32
    %17 = arith.cmpi ne, %16, %c0_i32_7 : i32
    scf.if %17 {
      %c0_10 = arith.constant 0 : index
      %c0_11 = arith.constant 0 : index
      %21 = vector.load %arg5[%c0_10, %c0_11] : memref<128x128xf32, #tpu.memory_space<vmem>>, vector<128x128xf32>
      tpu.vector_store %arg5[%c0_10, %c0_11], %14 {strides = array<i32>} : memref<128x128xf32, #tpu.memory_space<vmem>>, vector<128x128xf32>,
    } else {
    }
    %c0_i32_8 = arith.constant 0 : i32
    %18 = arith.cmpi sgt, %arg1, %c0_i32_8 : i32
    %19 = arith.extui %18 : i1 to i32
    %c0_i32_9 = arith.constant 0 : i32
    %20 = arith.cmpi ne, %19, %c0_i32_9 : i32
    scf.if %20 {
      %c0_10 = arith.constant 0 : index
      %c0_11 = arith.constant 0 : index
      %21 = vector.load %arg5[%c0_10, %c0_11] : memref<128x128xf32, #tpu.memory_space<vmem>>, vector<128x128xf32>
      %22 = arith.addf %21, %14 : vector<128x128xf32>
      %c0_12 = arith.constant 0 : index
      %c0_13 = arith.constant 0 : index
      %23 = vector.load %arg5[%c0_12, %c0_13] : memref<128x128xf32, #tpu.memory_space<vmem>>, vector<128x128xf32>
      tpu.vector_store %arg5[%c0_12, %c0_13], %22 {strides = array<i32>} : memref<128x128xf32, #tpu.memory_space<vmem>>, vector<128x128xf32>,
    } else {
    }
    return
  }
  func.func @transform_0(%arg0: i32, %arg1: i32) -> (i32, i32) {
    %c0_i32 = arith.constant 0 : i32
    %c0_i32_0 = arith.constant 0 : i32
    return %arg0, %c0_i32 : i32, i32
  }
  func.func @transform_1(%arg0: i32, %arg1: i32) -> (i32, i32) {
    %c0_i32 = arith.constant 0 : i32
    %c0_i32_0 = arith.constant 0 : i32
    return %c0_i32, %arg1 : i32, i32
  }
  func.func @transform_2(%arg0: i32, %arg1: i32) -> (i32, i32) {
    %c0_i32 = arith.constant 0 : i32
    %c0_i32_0 = arith.constant 0 : i32
    return %arg1, %c0_i32 : i32, i32
  }
  func.func @transform_3(%arg0: i32, %arg1: i32) -> (i32, i32) {
    %c0_i32 = arith.constant 0 : i32
    %c0_i32_0 = arith.constant 0 : i32
    return %arg0, %c0_i32 : i32, i32
  }
}

</mosaic_0001>

<bundles_post_ra>
// kernel: baichuan_mlp.1
= control target key start
LH: loop header
LB: loop body
LE: loop exit
PB: predicated region body
PF: predicated region fallthrough
CT: control target
= control target key end

     0   :  { %8 = vsyncpa [#allocation4], 0  ;;  %s2714_s0 = inlined_call_operand.vmem [shape: bf16[256,128], index: 0, kind: input, shape index: {}]   ;;  %s2715_s1 = inlined_call_operand.vmem [shape: bf16[128,1024], index: 1, kind: input, shape index: {}]   ;;  %s2716_s2 = inlined_call_operand.vmem [shape: bf16[512,128], index: 2, kind: input, shape index: {}]   ;;  %s2717_s3 = inlined_call_operand.hbm [shape: f32[256,128], index: 3, kind: output, shape index: {}]  }
   0x1   :  { %10 = vsyncpa [#allocation4 + $0x1], 0  ;;  %s2095_s12 = smov 0   ;;  %s2097_s13 = smov 0  }
   0x2   :  { %s2099_s14 = smov 0   ;;  %s2101_s15 = smov 0  }
   0x3   :  { %s2103_s16 = smov 0   ;;  %s2105_s17 = smov 0  }
   0x4   :  { %s2107_s18 = smov 0   ;;  %s2109_s19 = smov 0  }
   0x5   :  { %s2111_s20 = smov 0   ;;  %s2113_s21 = smov 0  }
   0x6 LB: > { %s1478_s22 = sadd.s32 4294967295, %s2069_s21   ;;  %s1479_s23 = sadd.s32 4294967294, %s2069_s21   ;;  %s2069_s21 = sphi %s2113_s21, %s16_s21   ;;  %s2065_s20 = sphi %s2111_s20, %s2729_s20   ;;  %s2061_s19 = sphi %s2109_s19, %s2728_s19   ;;  %s2057_s18 = sphi %s2107_s18, %s2727_s18   ;;  %s2053_s17 = sphi %s2105_s17, %s2726_s17   ;;  %s2049_s16 = sphi %s2103_s16, %s2725_s16   ;;  %s2045_s15 = sphi %s2101_s15, %s2724_s15   ;;  %s2041_s14 = sphi %s2099_s14, %s2723_s14   ;;  %s2037_s13 = sphi %s2097_s13, %s2722_s13   ;;  %s2033_s12 = sphi %s2095_s12, %s2721_s12  }
   0x7   : > { %s25_s24 = sadd.s32 1, %s2061_s19  ;;  %s28_s25 = sadd.s32 1, %s2065_s20 }
   0x8   : > { %p26_p0 = scmp.ge.s32.totalorder %s25_s24, 2  ;;  %s61_s26 = sadd.s32 1, %s2049_s16 }
   0x9   : > { %p68_p1 = scmp.ne.s32.totalorder %s2049_s16, %s2045_s15  ;;  %p69_p2 = scmp.eq.s32.totalorder %s2069_s21, 0 }
   0xa   : > { %s2731_s24 = smov (%p26_p0, %s25_s24), 0  ;;  %s2733_s25 = smov (!%p26_p0, %s28_s25), %s2065_s20 }
   0xb   : > { %s58_s27 = ssub.s32 %s2061_s19, %s2731_s24  ;;  %p2158_p3 = por %p69_p2, %p68_p1 }
   0xc   : > { %p30_p4 = scmp.ge.s32.totalorder %s2733_s25, 2  ;;  %p59_p5 = scmp.eq.s32.totalorder %s58_s27, 0 }
   0xd   : > { %s113_s29 = sadd.s32 1, %s2041_s14  ;;  %p123_p6 = scmp.ne.s32.totalorder %s2041_s14, %s2037_s13 }
   0xe   : > { %s2735_s25 = smov (%p30_p4, %s2733_s25), 0  ;;  %p124_p7 = scmp.eq.s32.totalorder %s1478_s22, 3 }
   0xf   : > { %s2168_s30 = scalar_select %p59_p5, %s2049_s16, %s61_s26  }
  0x10   : > { %s110_s4 = ssub.s32 %s2065_s20, %s2735_s25  ;;  %p129_p9 = scmp.ne.s32.totalorder %s2037_s13, %s2033_s12 }
  0x11   : > { %p111_p8 = scmp.eq.s32.totalorder %s110_s4, 0  ;;  %p2174_p10 = por %p124_p7, %p123_p6 }
  0x12   : > { %p130_p11 = scmp.eq.s32.totalorder %s1479_s23, 3  ;;  %p1481_p13 = scmp.ge.s32.totalorder %s2069_s21, 4 }
  0x13   : > { %s2179_s6 = scalar_select %p111_p8, %s2041_s14, %s113_s29  }
  0x14   : > { %p2181_p12 = por %p130_p11, %p129_p9  ;;  %146 = sbr.rel (%p1481_p13) target bundleno = 47 (0x2f), region = 16 }
  0x1b   : > { %158 = sbr.rel (!%p2158_p3) target bundleno = 47 (0x2f), region = 24  ;;  %s160_s8 = sand.u32 (%p2158_p3), 1, %s2049_s16  }
  0x1c   : > { %s1587_s9 = sshll.u32 (%p2158_p3), %s2061_s19, 4  ;;  %s1482_s10 = sshll.u32 (%p2158_p3), %s160_s8, 8 }
  0x1d   : > { %s2193_s23 = scalar_lea.vmem (%p2158_p3), %s2715_s1, %s1587_s9  ;;  %s2198_s26 = scalar_lea.vmem (%p2158_p3), [#allocation2], %s1482_s10 }
  0x1e   : > { %v178_v0 = vld [vmem:[%s2193_s23] sm:$0xff] (%p2158_p3)  ;;  %v180_v1 = vld [vmem:[%s2193_s23 + $0x8] sm:$0xff] (%p2158_p3) }
  0x1f   : > { %v182_v2 = vld [vmem:[%s2193_s23 + $0x20] sm:$0xff] (%p2158_p3)  ;;  %179 = vst [vmem:[%s2198_s26] sm:$0xff] (%p2158_p3), %v178_v0  ;;  %181 = vst [vmem:[%s2198_s26 + $0x8] sm:$0xff] (%p2158_p3), %v180_v1  ;;  %v184_v3 = vld [vmem:[%s2193_s23 + $0x28] sm:$0xff] (%p2158_p3) }
  0x20   : > { %183 = vst [vmem:[%s2198_s26 + $0x10] sm:$0xff] (%p2158_p3), %v182_v2  ;;  %v186_v4 = vld [vmem:[%s2193_s23 + $0x40] sm:$0xff] (%p2158_p3)  ;;  %v188_v5 = vld [vmem:[%s2193_s23 + $0x48] sm:$0xff] (%p2158_p3)  ;;  %185 = vst [vmem:[%s2198_s26 + $0x18] sm:$0xff] (%p2158_p3), %v184_v3 }
  0x21   : > { %187 = vst [vmem:[%s2198_s26 + $0x20] sm:$0xff] (%p2158_p3), %v186_v4  ;;  %189 = vst [vmem:[%s2198_s26 + $0x28] sm:$0xff] (%p2158_p3), %v188_v5  ;;  %v190_v6 = vld [vmem:[%s2193_s23 + $0x60] sm:$0xff] (%p2158_p3)  ;;  %v192_v7 = vld [vmem:[%s2193_s23 + $0x68] sm:$0xff] (%p2158_p3) }
  0x22   : > { %v194_v8 = vld [vmem:[%s2193_s23 + $0x80] sm:$0xff]  ;;  %191 = vst [vmem:[%s2198_s26 + $0x30] sm:$0xff] %v190_v6  ;;  %193 = vst [vmem:[%s2198_s26 + $0x38] sm:$0xff] %v192_v7  ;;  %v196_v9 = vld [vmem:[%s2193_s23 + $0x88] sm:$0xff] }
  0x23   : > { %195 = vst [vmem:[%s2198_s26 + $0x40] sm:$0xff] %v194_v8  ;;  %v198_v10 = vld [vmem:[%s2193_s23 + $0xa0] sm:$0xff]  ;;  %v200_v11 = vld [vmem:[%s2193_s23 + $0xa8] sm:$0xff]  ;;  %197 = vst [vmem:[%s2198_s26 + $0x48] sm:$0xff] %v196_v9 }
  0x24   : > { %199 = vst [vmem:[%s2198_s26 + $0x50] sm:$0xff] %v198_v10  ;;  %201 = vst [vmem:[%s2198_s26 + $0x58] sm:$0xff] %v200_v11  ;;  %v202_v12 = vld [vmem:[%s2193_s23 + $0xc0] sm:$0xff]  ;;  %v204_v13 = vld [vmem:[%s2193_s23 + $0xc8] sm:$0xff] }
  0x25   : > { %v206_v14 = vld [vmem:[%s2193_s23 + $0xe0] sm:$0xff]  ;;  %203 = vst [vmem:[%s2198_s26 + $0x60] sm:$0xff] %v202_v12  ;;  %205 = vst [vmem:[%s2198_s26 + $0x68] sm:$0xff] %v204_v13  ;;  %v208_v15 = vld [vmem:[%s2193_s23 + $0xe8] sm:$0xff] }
  0x26   : > { %207 = vst [vmem:[%s2198_s26 + $0x70] sm:$0xff] %v206_v14  ;;  %v210_v16 = vld [vmem:[%s2193_s23 + $0x100] sm:$0xff]  ;;  %v212_v17 = vld [vmem:[%s2193_s23 + $0x108] sm:$0xff]  ;;  %209 = vst [vmem:[%s2198_s26 + $0x78] sm:$0xff] %v208_v15 }
  0x27   : > { %211 = vst [vmem:[%s2198_s26 + $0x80] sm:$0xff] %v210_v16  ;;  %213 = vst [vmem:[%s2198_s26 + $0x88] sm:$0xff] %v212_v17  ;;  %v214_v18 = vld [vmem:[%s2193_s23 + $0x120] sm:$0xff]  ;;  %v216_v19 = vld [vmem:[%s2193_s23 + $0x128] sm:$0xff] }
  0x28   : > { %v218_v20 = vld [vmem:[%s2193_s23 + $0x140] sm:$0xff]  ;;  %215 = vst [vmem:[%s2198_s26 + $0x90] sm:$0xff] %v214_v18  ;;  %217 = vst [vmem:[%s2198_s26 + $0x98] sm:$0xff] %v216_v19  ;;  %v220_v21 = vld [vmem:[%s2193_s23 + $0x148] sm:$0xff] }
  0x29   : > { %219 = vst [vmem:[%s2198_s26 + $0xa0] sm:$0xff] %v218_v20  ;;  %v222_v22 = vld [vmem:[%s2193_s23 + $0x160] sm:$0xff]  ;;  %v224_v23 = vld [vmem:[%s2193_s23 + $0x168] sm:$0xff]  ;;  %221 = vst [vmem:[%s2198_s26 + $0xa8] sm:$0xff] %v220_v21 }
  0x2a   : > { %223 = vst [vmem:[%s2198_s26 + $0xb0] sm:$0xff] %v222_v22  ;;  %225 = vst [vmem:[%s2198_s26 + $0xb8] sm:$0xff] %v224_v23  ;;  %v226_v24 = vld [vmem:[%s2193_s23 + $0x180] sm:$0xff]  ;;  %v228_v25 = vld [vmem:[%s2193_s23 + $0x188] sm:$0xff] }
  0x2b   : > { %v230_v26 = vld [vmem:[%s2193_s23 + $0x1a0] sm:$0xff]  ;;  %227 = vst [vmem:[%s2198_s26 + $0xc0] sm:$0xff] %v226_v24  ;;  %229 = vst [vmem:[%s2198_s26 + $0xc8] sm:$0xff] %v228_v25  ;;  %v232_v27 = vld [vmem:[%s2193_s23 + $0x1a8] sm:$0xff] }
  0x2c   : > { %231 = vst [vmem:[%s2198_s26 + $0xd0] sm:$0xff] %v230_v26  ;;  %v234_v28 = vld [vmem:[%s2193_s23 + $0x1c0] sm:$0xff]  ;;  %v236_v29 = vld [vmem:[%s2193_s23 + $0x1c8] sm:$0xff]  ;;  %233 = vst [vmem:[%s2198_s26 + $0xd8] sm:$0xff] %v232_v27 }
  0x2d   : > { %235 = vst [vmem:[%s2198_s26 + $0xe0] sm:$0xff] %v234_v28  ;;  %237 = vst [vmem:[%s2198_s26 + $0xe8] sm:$0xff] %v236_v29  ;;  %v238_v30 = vld [vmem:[%s2193_s23 + $0x1e0] sm:$0xff]  ;;  %v240_v31 = vld [vmem:[%s2193_s23 + $0x1e8] sm:$0xff] }
  0x2e   : > { %239 = vst [vmem:[%s2198_s26 + $0xf0] sm:$0xff] %v238_v30  ;;  %241 = vst [vmem:[%s2198_s26 + $0xf8] sm:$0xff] %v240_v31 }
  0x2f PF: > { %p1485_p0 = scmp.ge.s32.totalorder %s2069_s21, 1  ;;  %p255_p1 = scmp.lt.s32.totalorder %s2069_s21, 5 }
  0x31   : > { %p256_p2 = pnand %p1485_p0, %p255_p1 }
  0x32   : > { %s262_s27 = sand.u32 (!%p256_p2), 1, %s2045_s15   ;;  %s292_s28 = sand.u32 (!%p256_p2), 1, %s2037_s13   ;;  %v2071_v32 = vmov (!%p256_p2), 0  }
  0x33   : > { %259 = sbr.rel (%p256_p2) target bundleno = 674 (0x2a2), region = 51  ;;  %s1486_s29 = sshll.u32 (!%p256_p2), %s262_s27, 8  ;;  %598 = vmatprep.mubr.bf16.mxu0 (!%p256_p2), %v2071_v32  ;;  %638 = vmatprep.mubr.bf16.mxu1 (!%p256_p2), %v2071_v32 }
  0x34   : > { %s2267_s4 = sshll.u32 (!%p256_p2), %s292_s28, 7  ;;  %s2271_s8 = scalar_lea.vmem (!%p256_p2), [#allocation2], %s1486_s29 }
  0x35   : > { %v1759_v33 = vld [vmem:[%s2271_s8 + $0x4] ss:$16 sps:$4 sm:$0xff] (!%p256_p2)   ;;  %s1488_s9 = sshll.u32 (!%p256_p2), %s2057_s18, 4  ;;  %v1761_v34 = vld [vmem:[%s2271_s8] ss:$16 sps:$4 sm:$0xff] (!%p256_p2)   ;;  %s1490_s23 = sshll.u32 (!%p256_p2), %s2053_s17, 5 }
  0x36   : > { %p296_p3 = scmp.lt.s32.totalorder (!%p256_p2), %s1488_s9, 31  ;;  %566 = vmatprep.subr.bf16.mxu0 (!%p256_p2), %v1759_v33  ;;  %1653 = vmatprep.subr.bf16.mxu1 (!%p256_p2), %v1759_v33  ;;  %v1762_v35 = vld [vmem:[%s2271_s8 + $0x24] ss:$16 sps:$4 sm:$0xff] (!%p256_p2)   ;;  %v1764_v36 = vld [vmem:[%s2271_s8 + $0x20] ss:$16 sps:$4 sm:$0xff] (!%p256_p2)   ;;  %p303_p4 = scmp.lt.s32.totalorder (!%p256_p2), %s1490_s23, 63 }
  0x37   : > { %567 = vmatpush1.bf16.msra.mxu0 (!%p256_p2), %v1761_v34  ;;  %1661 = vmatpush1.bf16.msra.mxu1 (!%p256_p2), %v1761_v34  ;;  %v1765_v37 = vld [vmem:[%s2271_s8 + $0x44] ss:$16 sps:$4 sm:$0xff] (!%p256_p2)   ;;  %v1767_v38 = vld [vmem:[%s2271_s8 + $0x40] ss:$16 sps:$4 sm:$0xff] (!%p256_p2)   ;;  %v1787_v49 = vld [vmem:[%s2271_s8 + $0xc] ss:$16 sps:$4 sm:$0xff] (!%p256_p2)  }
  0x38   : > { %568 = vmatprep.subr.bf16.mxu0 (!%p256_p2), %v1762_v35  ;;  %1654 = vmatprep.subr.bf16.mxu1 (!%p256_p2), %v1762_v35  ;;  %v1768_v39 = vld [vmem:[%s2271_s8 + $0x64] ss:$16 sps:$4 sm:$0xff] (!%p256_p2)   ;;  %v1770_v40 = vld [vmem:[%s2271_s8 + $0x60] ss:$16 sps:$4 sm:$0xff] (!%p256_p2)   ;;  %v1785_v52 = vld [vmem:[%s2271_s8 + $0x8] ss:$16 sps:$4 sm:$0xff] (!%p256_p2)  }
  0x39   : > { %v1771_v41 = vld [vmem:[%s2271_s8 + $0x84] ss:$16 sps:$4 sm:$0xff] (!%p256_p2)   ;;  %v1773_v42 = vld [vmem:[%s2271_s8 + $0x80] ss:$16 sps:$4 sm:$0xff] (!%p256_p2)   ;;  %v1790_v53 = vld [vmem:[%s2271_s8 + $0x2c] ss:$16 sps:$4 sm:$0xff] (!%p256_p2)  }
  0x3a   : > { %s2737_s9 = smov (!%p296_p3, %s1488_s9), 31  ;;  %v1774_v43 = vld [vmem:[%s2271_s8 + $0xa4] ss:$16 sps:$4 sm:$0xff]   ;;  %v1776_v44 = vld [vmem:[%s2271_s8 + $0xa0] ss:$16 sps:$4 sm:$0xff]   ;;  %s2739_s23 = smov (!%p303_p4, %s1490_s23), 63 }
  0x3b   : > { %s1489_s15 = sshll.u32 %s2737_s9, 2  ;;  %569 = vmatpush1.bf16.msra.mxu0 %v1764_v36  ;;  %1662 = vmatpush1.bf16.msra.mxu1 %v1764_v36  ;;  %v1777_v45 = vld [vmem:[%s2271_s8 + $0xc4] ss:$16 sps:$4 sm:$0xff]   ;;  %v1779_v46 = vld [vmem:[%s2271_s8 + $0xc0] ss:$16 sps:$4 sm:$0xff]   ;;  %s1491_s26 = sshll.u32 %s2739_s23, 2 }
  0x3c   : > { %570 = vmatprep.subr.bf16.mxu0 %v1765_v37  ;;  %1655 = vmatprep.subr.bf16.mxu1 %v1765_v37  ;;  %s2284_s22 = scalar_lea.vmem %s2714_s0, %s1489_s15  ;;  %v1780_v47 = vld [vmem:[%s2271_s8 + $0xe4] ss:$16 sps:$4 sm:$0xff]   ;;  %v1782_v48 = vld [vmem:[%s2271_s8 + $0xe0] ss:$16 sps:$4 sm:$0xff]   ;;  %v1788_v54 = vld [vmem:[%s2271_s8 + $0x28] ss:$16 sps:$4 sm:$0xff]  }
  0x3d   : > { %v1783_v50 = vld [vmem:[%s2284_s22] sm:$0xff]   ;;  %v1795_v55 = vld [vmem:[%s2271_s8 + $0x4c] ss:$16 sps:$4 sm:$0xff]   ;;  %v1793_v58 = vld [vmem:[%s2271_s8 + $0x48] ss:$16 sps:$4 sm:$0xff]   ;;  %s2561_s9 = scalar_lea.vmem [#allocation3], %s2267_s4 }
  0x3e   : > { %v1784_v51 = vld [vmem:[%s2284_s22 + $0x20] sm:$0xff]   ;;  %v1791_v56 = vld [vmem:[%s2284_s22 + $0x8] sm:$0xff]   ;;  %v1799_v62 = vld [vmem:[%s2284_s22 + $0x10] sm:$0xff]   ;;  %p1580_p5 = scmp.ne.s32.totalorder %s2053_s17, 0 }
  0x3f   : > { %571 = vmatpush1.bf16.msra.mxu0 %v1767_v38  ;;  %1663 = vmatpush1.bf16.msra.mxu1 %v1767_v38  ;;  %v1792_v57 = vld [vmem:[%s2284_s22 + $0x28] sm:$0xff]   ;;  %v1800_v63 = vld [vmem:[%s2284_s22 + $0x30] sm:$0xff]   ;;  %v1807_v4 = vld [vmem:[%s2284_s22 + $0x18] sm:$0xff]  }
  0x40   : > { %572 = vmatprep.subr.bf16.mxu0 %v1768_v39  ;;  %1656 = vmatprep.subr.bf16.mxu1 %v1768_v39  ;;  %v1798_v59 = vld [vmem:[%s2271_s8 + $0x6c] ss:$16 sps:$4 sm:$0xff]   ;;  %v1796_v60 = vld [vmem:[%s2271_s8 + $0x68] ss:$16 sps:$4 sm:$0xff]  }
  0x41   : > { %v1803_v61 = vld [vmem:[%s2271_s8 + $0x8c] ss:$16 sps:$4 sm:$0xff]   ;;  %v1801_v0 = vld [vmem:[%s2271_s8 + $0x88] ss:$16 sps:$4 sm:$0xff]  }
  0x42   : > { %v1806_v1 = vld [vmem:[%s2271_s8 + $0xac] ss:$16 sps:$4 sm:$0xff]   ;;  %v1804_v2 = vld [vmem:[%s2271_s8 + $0xa8] ss:$16 sps:$4 sm:$0xff]  }
  0x43   : > { %573 = vmatpush1.bf16.msra.mxu0 %v1770_v40  ;;  %1664 = vmatpush1.bf16.msra.mxu1 %v1770_v40  ;;  %v1811_v3 = vld [vmem:[%s2271_s8 + $0xcc] ss:$16 sps:$4 sm:$0xff]   ;;  %v1809_v6 = vld [vmem:[%s2271_s8 + $0xc8] ss:$16 sps:$4 sm:$0xff]  }
  0x44   : > { %574 = vmatprep.subr.bf16.mxu0 %v1771_v41  ;;  %1657 = vmatprep.subr.bf16.mxu1 %v1771_v41  ;;  %v1808_v5 = vld [vmem:[%s2284_s22 + $0x38] sm:$0xff]  }
  0x45   : > { %v1814_v7 = vld [vmem:[%s2271_s8 + $0xec] ss:$16 sps:$4 sm:$0xff]   ;;  %v1812_v8 = vld [vmem:[%s2271_s8 + $0xe8] ss:$16 sps:$4 sm:$0xff]   ;;  %s306_s8 = scalar_lea.vmem %s2716_s2, %s1491_s26 }
  0x46   : > { %v1815_v9 = vld [vmem:[%s306_s8 + $0x40] sm:$0xff]   ;;  %v1817_v11 = vld [vmem:[%s306_s8 + $0x48] sm:$0xff]   ;;  %v1819_v13 = vld [vmem:[%s306_s8 + $0x50] sm:$0xff]  }
  0x47   : > { %575 = vmatpush1.bf16.msra.mxu0 %v1773_v42  ;;  %1665 = vmatpush1.bf16.msra.mxu1 %v1773_v42  ;;  %v1816_v10 = vld [vmem:[%s306_s8] sm:$0xff]   ;;  %v1818_v12 = vld [vmem:[%s306_s8 + $0x8] sm:$0xff]   ;;  %v1820_v14 = vld [vmem:[%s306_s8 + $0x10] sm:$0xff]  }
  0x48   : > { %576 = vmatprep.subr.bf16.mxu0 %v1774_v43  ;;  %1658 = vmatprep.subr.bf16.mxu1 %v1774_v43  ;;  %v1821_v15 = vld [vmem:[%s306_s8 + $0x58] sm:$0xff]   ;;  %v1823_v17 = vld [vmem:[%s306_s8 + $0x60] sm:$0xff]   ;;  %v1825_v19 = vld [vmem:[%s306_s8 + $0x68] sm:$0xff]  }
  0x49   : > { %v1822_v16 = vld [vmem:[%s306_s8 + $0x18] sm:$0xff]   ;;  %v1824_v18 = vld [vmem:[%s306_s8 + $0x20] sm:$0xff]   ;;  %v1826_v20 = vld [vmem:[%s306_s8 + $0x28] sm:$0xff]  }
  0x4a   : > { %v1827_v21 = vld [vmem:[%s306_s8 + $0x70] sm:$0xff]   ;;  %v1829_v23 = vld [vmem:[%s306_s8 + $0x78] sm:$0xff]  }
  0x4b   : > { %577 = vmatpush1.bf16.msra.mxu0 %v1776_v44  ;;  %1666 = vmatpush1.bf16.msra.mxu1 %v1776_v44  ;;  %v1828_v22 = vld [vmem:[%s306_s8 + $0x30] sm:$0xff]   ;;  %v1830_v24 = vld [vmem:[%s306_s8 + $0x38] sm:$0xff]  }
  0x4c   : > { %578 = vmatprep.subr.bf16.mxu0 %v1777_v45  ;;  %1659 = vmatprep.subr.bf16.mxu1 %v1777_v45 }
  0x4f   : > { %579 = vmatpush1.bf16.msra.mxu0 %v1779_v46  ;;  %1667 = vmatpush1.bf16.msra.mxu1 %v1779_v46 }
  0x50   : > { %580 = vmatprep.subr.bf16.mxu0 %v1780_v47  ;;  %1660 = vmatprep.subr.bf16.mxu1 %v1780_v47 }
  0x53   : > { %581 = vmatpush1.bf16.msra.mxu0 %v1782_v48  ;;  %1668 = vmatpush1.bf16.msra.mxu1 %v1782_v48 }
  0x54   : > { %679 = vmatprep.subr.bf16.mxu1 %v1787_v49  ;;  %1589 = vmatprep.subr.bf16.mxu0 %v1815_v9 }
  0x56   : > { %599 = vmatmul.mubr.bf16.vlgmr.msra.gmra.mrb[0].mxu0 %v1783_v50  ;;  %639 = vmatmul.mubr.bf16.vlgmr.msra.gmra.mrb[0].mxu1 %v1784_v51 }
  0x57   : > { %680 = vmatpush1.bf16.msra.mxu1 %v1785_v52  ;;  %608 = vmatprep.mubr.bf16.mxu0 %v2071_v32 }
  0x58   : > { %681 = vmatprep.subr.bf16.mxu1 %v1790_v53  ;;  %648 = vmatprep.mubr.bf16.mxu1 %v2071_v32 }
  0x59   : > { %1590 = vmatpush3.bf16.msra.mxu0 %v1816_v10 }
  0x5a   : > { %1591 = vmatprep.subr.bf16.mxu0 %v1817_v11 }
  0x5b   : > { %682 = vmatpush1.bf16.msra.mxu1 %v1788_v54 }
  0x5c   : > { %683 = vmatprep.subr.bf16.mxu1 %v1795_v55 }
  0x5d   : > { %1592 = vmatpush3.bf16.msra.mxu0 %v1818_v12 }
  0x5e   : > { %609 = vmatmul.mubr.bf16.gmra.mrb[4].mxu0 %v1791_v56  ;;  %649 = vmatmul.mubr.bf16.gmra.mrb[4].mxu1 %v1792_v57 }
  0x5f   : > { %684 = vmatpush1.bf16.msra.mxu1 %v1793_v58  ;;  %618 = vmatprep.mubr.bf16.mxu0 %v2071_v32 }
  0x60   : > { %685 = vmatprep.subr.bf16.mxu1 %v1798_v59  ;;  %658 = vmatprep.mubr.bf16.mxu1 %v2071_v32 }
  0x61   : > { %1593 = vmatprep.subr.bf16.mxu0 %v1819_v13 }
  0x62   : > { %1594 = vmatpush3.bf16.msra.mxu0 %v1820_v14 }
  0x63   : > { %686 = vmatpush1.bf16.msra.mxu1 %v1796_v60  ;;  %1595 = vmatprep.subr.bf16.mxu0 %v1821_v15 }
  0x64   : > { %687 = vmatprep.subr.bf16.mxu1 %v1803_v61 }
  0x66   : > { %619 = vmatmul.mubr.bf16.gmra.mrb[8].mxu0 %v1799_v62  ;;  %659 = vmatmul.mubr.bf16.gmra.mrb[8].mxu1 %v1800_v63 }
  0x67   : > { %688 = vmatpush1.bf16.msra.mxu1 %v1801_v0  ;;  %628 = vmatprep.mubr.bf16.mxu0 %v2071_v32 }
  0x68   : > { %689 = vmatprep.subr.bf16.mxu1 %v1806_v1  ;;  %668 = vmatprep.mubr.bf16.mxu1 %v2071_v32 }
  0x69   : > { %1596 = vmatpush3.bf16.msra.mxu0 %v1822_v16 }
  0x6a   : > { %1597 = vmatprep.subr.bf16.mxu0 %v1823_v17 }
  0x6b   : > { %690 = vmatpush1.bf16.msra.mxu1 %v1804_v2 }
  0x6c   : > { %691 = vmatprep.subr.bf16.mxu1 %v1811_v3 }
  0x6d   : > { %1598 = vmatpush3.bf16.msra.mxu0 %v1824_v18 }
  0x6e   : > { %629 = vmatmul.mubr.bf16.gmra.mrb[12].mxu0 %v1807_v4  ;;  %669 = vmatmul.mubr.bf16.gmra.mrb[12].mxu1 %v1808_v5 }
  0x6f   : > { %692 = vmatpush1.bf16.msra.mxu1 %v1809_v6  ;;  %711 = vmatprep.mubr.bf16.mxu1 %v2071_v32 }
  0x70   : > { %693 = vmatprep.subr.bf16.mxu1 %v1814_v7  ;;  %1599 = vmatprep.subr.bf16.mxu0 %v1825_v19 }
  0x71   : > { %1600 = vmatpush3.bf16.msra.mxu0 %v1826_v20 }
  0x72   : > { %1601 = vmatprep.subr.bf16.mxu0 %v1827_v21 }
  0x73   : > { %694 = vmatpush1.bf16.msra.mxu1 %v1812_v8 }
  0x75   : > { %1602 = vmatpush3.bf16.msra.mxu0 %v1828_v22 }
  0x76   : > { %712 = vmatmul.mubr.bf16.vlgmr.msra.gmra.mrb[16].mxu1 %v1783_v50  ;;  %1603 = vmatprep.subr.bf16.mxu0 %v1829_v23 }
  0x77   : > { %721 = vmatprep.mubr.bf16.mxu1 %v2071_v32 }
  0x79   : > { %1604 = vmatpush3.bf16.msra.mxu0 %v1830_v24 }
  0x7e   : > { %722 = vmatmul.mubr.bf16.gmra.mrb[20].mxu1 %v1791_v56 }
  0x7f   : > { %731 = vmatprep.mubr.bf16.mxu1 %v2071_v32 }
  0x86   : > { %732 = vmatmul.mubr.bf16.gmra.mrb[24].mxu1 %v1799_v62 }
  0x87   : > { %741 = vmatprep.mubr.bf16.mxu1 %v2071_v32 }
  0x8e   : > { %742 = vmatmul.mubr.bf16.gmra.mrb[28].mxu1 %v1807_v4 }
  0x8f   : > { %751 = vmatprep.mubr.bf16.mxu1 %v2071_v32 }
  0x96   : > { %752 = vmatmul.mubr.bf16.gmra.mrb[32].mxu1 %v1784_v51 }
  0x97   : > { %761 = vmatprep.mubr.bf16.mxu1 %v2071_v32 }
  0x9e   : > { %762 = vmatmul.mubr.bf16.gmra.mrb[36].mxu1 %v1792_v57 }
  0x9f   : > { %771 = vmatprep.mubr.bf16.mxu1 %v2071_v32 }
  0xa6   : > { %772 = vmatmul.mubr.bf16.gmra.mrb[40].mxu1 %v1800_v63 }
  0xa7   : > { %781 = vmatprep.mubr.bf16.mxu1 %v2071_v32 }
  0xae   : > { %782 = vmatmul.mubr.bf16.gmra.mrb[44].mxu1 %v1808_v5 }
 0x129   : > { %v2337_v25 = vpop.f32.mrb[0].mxu0  ;;  %v2339_v26 = vpop.f32.mrb[0].mxu1 }
 0x12a   : > { %v1532_v27 = vmul.f32 -1.442695, %v2337_v25  ;;  %v2342_v28 = vpop.f32.mrb[1].mxu0  ;;  %v2344_v29 = vpop.f32.mrb[1].mxu1  ;;  %v1548_v37 = vmul.f32 -1.442695, %v2339_v26 }
 0x12b   : > { %v1533_v30 = vmul.f32 -1.442695, %v2342_v28  ;;  %v2347_v31 = vpop.f32.mrb[2].mxu0  ;;  %v2349_v32 = vpop.f32.mrb[2].mxu1  ;;  %v1549_v43 = vmul.f32 -1.442695, %v2344_v29 }
 0x12c   : > { %1831 = vpow2.f32 %v1532_v27  ;;  %v1534_v33 = vmul.f32 -1.442695, %v2347_v31  ;;  %v2352_v34 = vpop.f32.mrb[3].mxu0  ;;  %v2354_v35 = vpop.f32.mrb[3].mxu1  ;;  %v1550_v50 = vmul.f32 -1.442695, %v2349_v32 }
 0x12d   : > { %1833 = vpow2.f32 %v1533_v30  ;;  %v1535_v36 = vmul.f32 -1.442695, %v2352_v34  ;;  %v1551_v52 = vmul.f32 -1.442695, %v2354_v35 }
 0x12e   : > { %1835 = vpow2.f32 %v1534_v33 }
 0x12f   : > { %1837 = vpow2.f32 %v1535_v36 }
 0x131   : > { %v2358_v38 = vpop.f32.mrb[4].mxu0  ;;  %v2360_v39 = vpop.f32.mrb[4].mxu1 }
 0x132   : > { %v1536_v40 = vmul.f32 -1.442695, %v2358_v38  ;;  %v2363_v41 = vpop.f32.mrb[5].mxu0  ;;  %v2365_v42 = vpop.f32.mrb[5].mxu1  ;;  %v1552_v59 = vmul.f32 -1.442695, %v2360_v39 }
 0x133   : > { %v1537_v44 = vmul.f32 -1.442695, %v2363_v41  ;;  %v2369_v45 = vpop.f32.mrb[6].mxu0  ;;  %v2371_v46 = vpop.f32.mrb[6].mxu1  ;;  %v1553_v3 = vmul.f32 -1.442695, %v2365_v42 }
 0x134   : > { %1839 = vpow2.f32 %v1536_v40  ;;  %v1538_v47 = vmul.f32 -1.442695, %v2369_v45  ;;  %v2374_v48 = vpop.f32.mrb[7].mxu0  ;;  %v2376_v49 = vpop.f32.mrb[7].mxu1 }
 0x135   : > { %1841 = vpow2.f32 %v1548_v37  ;;  %v1539_v19 = vmul.f32 -1.442695, %v2374_v48 }
 0x136   : > { %v1832_v51 = vpop.eup %1831  ;;  %1843 = vpow2.f32 %v1537_v44 }
 0x137   : > { %v888_v53 = vadd.f32 1.0, %v1832_v51  ;;  %1845 = vpow2.f32 %v1549_v43  ;;  %v1834_v54 = vpop.eup %1833 }
 0x138   : > { %1847 = vpow2.f32 %v1538_v47  ;;  %v889_v55 = vadd.f32 1.0, %v1834_v54  ;;  %v1836_v58 = vpop.eup %1835 }
 0x139   : > { %1849 = vpow2.f32 %v1550_v50  ;;  %v2380_v56 = vpop.f32.mrb[8].mxu0  ;;  %v2382_v57 = vpop.f32.mrb[8].mxu1  ;;  %v890_v61 = vadd.f32 1.0, %v1836_v58 }
 0x13a   : > { %1851 = vpow2.f32 %v1551_v52  ;;  %v2385_v60 = vpop.f32.mrb[9].mxu0  ;;  %v2387_v62 = vpop.f32.mrb[9].mxu1  ;;  %v1540_v33 = vmul.f32 -1.442695, %v2380_v56 }
 0x13b   : > { %1853 = vrcp.f32 %v888_v53  ;;  %v2389_v63 = vpop.f32.mrb[10].mxu0  ;;  %v1838_v0 = vpop.eup %1837  ;;  %v1541_v44 = vmul.f32 -1.442695, %v2385_v60 }
 0x13c   : > { %1855 = vrcp.f32 %v889_v55  ;;  %v2391_v1 = vpop.f32.mrb[10].mxu1  ;;  %v891_v2 = vadd.f32 1.0, %v1838_v0  ;;  %v2394_v4 = vpop.f32.mrb[11].mxu0  ;;  %v1542_v54 = vmul.f32 -1.442695, %v2389_v63 }
 0x13d   : > { %1857 = vrcp.f32 %v890_v61  ;;  %v2396_v5 = vpop.f32.mrb[11].mxu1 }
 0x13e   : > { %v1840_v6 = vpop.eup %1839  ;;  %1859 = vpow2.f32 %v1552_v59  ;;  %v1554_v59 = vmul.f32 -1.442695, %v2371_v46 }
 0x13f   : > { %v1842_v7 = vpop.eup %1841  ;;  %1861 = vrcp.f32 %v891_v2  ;;  %v892_v8 = vadd.f32 1.0, %v1840_v6 }
 0x140   : > { %v1844_v9 = vpop.eup %1843  ;;  %1863 = vpow2.f32 %v1553_v3  ;;  %v904_v15 = vadd.f32 1.0, %v1842_v7 }
 0x141   : > { %v1846_v10 = vpop.eup %1845  ;;  %v893_v11 = vadd.f32 1.0, %v1844_v9  ;;  %v2398_v12 = vpop.f32.mrb[12].mxu0  ;;  %1865 = vrcp.f32 %v892_v8 }
 0x142   : > { %v2400_v13 = vpop.f32.mrb[12].mxu1  ;;  %v1848_v14 = vpop.eup %1847  ;;  %v905_v23 = vadd.f32 1.0, %v1846_v10 }
 0x143   : > { %v2402_v16 = vpop.f32.mrb[13].mxu0  ;;  %v1850_v17 = vpop.eup %1849  ;;  %v894_v18 = vadd.f32 1.0, %v1848_v14  ;;  %1867 = vrcp.f32 %v893_v11 }
 0x144   : > { %v2405_v20 = vpop.f32.mrb[13].mxu1  ;;  %v2407_v21 = vpop.f32.mrb[14].mxu0  ;;  %v906_v40 = vadd.f32 1.0, %v1850_v17 }
 0x145   : > { %v1852_v22 = vpop.eup %1851  ;;  %v2409_v24 = vpop.f32.mrb[14].mxu1  ;;  %1869 = vrcp.f32 %v894_v18 }
 0x146   : > { %v2411_v27 = vpop.f32.mrb[15].mxu0  ;;  %v1854_v30 = vpop.eup %1853  ;;  %1871 = vrcp.f32 %v904_v15  ;;  %v907_v51 = vadd.f32 1.0, %v1852_v22 }
 0x147   : > { %v2414_v36 = vpop.f32.mrb[15].mxu1  ;;  %v1856_v37 = vpop.eup %1855  ;;  %1873 = vpow2.f32 %v1539_v19  ;;  %v984_v50 = vmul.f32 %v1854_v30, %v2337_v25  ;;  %v1543_v25 = vmul.f32 -1.442695, %v2394_v4 }
 0x148   : > { %v1858_v43 = vpop.eup %1857  ;;  %1875 = vrcp.f32 %v905_v23  ;;  %v985_v53 = vmul.f32 %v1856_v37, %v2342_v28  ;;  %v1556_v37 = vmul.f32 -1.442695, %v2382_v57 }
 0x149   : > { %v1860_v47 = vpop.eup %1859  ;;  %1877 = vpow2.f32 %v1540_v33  ;;  %v713_v55 = vpop.f32.mrb[16].mxu1  ;;  %v986_v58 = vmul.f32 %v1858_v43, %v2347_v31  ;;  %v1544_v31 = vmul.f32 -1.442695, %v2398_v12 }
 0x14a   : > { %v1862_v52 = vpop.eup %1861  ;;  %1879 = vrcp.f32 %v906_v40  ;;  %v1016_v61 = vmul.f32 %v984_v50, %v713_v55  ;;  %v715_v0 = vpop.f32.mrb[17].mxu1  ;;  %v908_v28 = vadd.f32 1.0, %v1860_v47 }
 0x14b   : > { %v1864_v2 = vpop.eup %1863  ;;  %v987_v3 = vmul.f32 %v1862_v52, %v2352_v34  ;;  %1881 = vpow2.f32 %v1541_v44  ;;  %v1017_v6 = vmul.f32 %v985_v53, %v715_v0  ;;  %v717_v7 = vpop.f32.mrb[18].mxu1  ;;  %v1555_v34 = vmul.f32 -1.442695, %v2376_v49 }
 0x14c   : > { %1883 = vrcp.f32 %v907_v51  ;;  %v1018_v8 = vmul.f32 %v986_v58, %v717_v7  ;;  %v719_v9 = vpop.f32.mrb[19].mxu1  ;;  %v1866_v10 = vpop.eup %1865  ;;  %v909_v15 = vadd.f32 1.0, %v1864_v2  ;;  %v1557_v52 = vmul.f32 -1.442695, %v2387_v62 }
 0x14d   : > { %1885 = vpow2.f32 %v1542_v54  ;;  %v1019_v11 = vmul.f32 %v987_v3, %v719_v9  ;;  %v1868_v14 = vpop.eup %1867  ;;  %v988_v23 = vmul.f32 %v1866_v10, %v2358_v38  ;;  %v1560_v9 = vmul.f32 -1.442695, %v2400_v13 }
 0x14e   : > { %1887 = vpow2.f32 %v1554_v59  ;;  %v1048_v17 = vpack.c.bf16 %v1018_v8, %v1016_v61  ;;  %v989_v33 = vmul.f32 %v1868_v14, %v2363_v41  ;;  %v1558_v61 = vmul.f32 -1.442695, %v2391_v1 }
 0x14f   : > { %v1870_v18 = vpop.eup %1869  ;;  %1889 = vpow2.f32 %v1543_v25  ;;  %v1049_v19 = vpack.c.bf16 %v1019_v11, %v1017_v6  ;;  %v1559_v6 = vmul.f32 -1.442695, %v2396_v5 }
 0x150   : > { %v2426_v22 = vpop.eup %1871  ;;  %1891 = vrcp.f32 %v908_v28  ;;  %v990_v44 = vmul.f32 %v1870_v18, %v2369_v45 }
 0x151   : > { %v1874_v30 = vpop.eup %1873  ;;  %1893 = vpow2.f32 %v1544_v31  ;;  %v723_v40 = vpop.f32.mrb[20].mxu1  ;;  %1224 = vmatprep.mubr.bf16.mxu0 %v1049_v19 }
 0x152   : > { %v2431_v43 = vpop.eup %1875  ;;  %1895 = vrcp.f32 %v909_v15  ;;  %v895_v47 = vadd.f32 1.0, %v1874_v30  ;;  %v2434_v50 = vmul.f32 %v988_v23, %v723_v40  ;;  %v725_v51 = vpop.f32.mrb[21].mxu1  ;;  %1225 = vmatmul.mubr.bf16.vlgmr.msra.gmra.mrb[16].mxu0 %v1048_v17  ;;  %v1545_v23 = vmul.f32 -1.442695, %v2402_v16 }
 0x153   : > { %v1878_v38 = vpop.eup %1877  ;;  %1897 = vpow2.f32 %v1555_v34  ;;  %v2437_v41 = vmul.f32 %v989_v33, %v725_v51  ;;  %v727_v53 = vpop.f32.mrb[22].mxu1 }
 0x154   : > { %v2439_v54 = vpop.eup %1879  ;;  %1899 = vrcp.f32 %v895_v47  ;;  %v896_v55 = vadd.f32 1.0, %v1878_v38  ;;  %v2441_v58 = vmul.f32 %v990_v44, %v727_v53  ;;  %v729_v59 = vpop.f32.mrb[23].mxu1  ;;  %v1546_v44 = vmul.f32 -1.442695, %v2407_v21 }
 0x155   : > { %v1882_v45 = vpop.eup %1881  ;;  %1901 = vpow2.f32 %v1556_v37  ;;  %v1561_v37 = vmul.f32 -1.442695, %v2405_v20  ;;  %v1562_v38 = vmul.f32 -1.442695, %v2409_v24  ;;  %v1547_v53 = vmul.f32 -1.442695, %v2411_v27 }
 0x156   : > { %v2444_v0 = vpop.eup %1883  ;;  %1903 = vrcp.f32 %v896_v55  ;;  %v897_v2 = vadd.f32 1.0, %v1882_v45  ;;  %v1050_v3 = vpack.c.bf16 %v2441_v58, %v2434_v50 }
 0x157   : > { %v1886_v25 = vpop.eup %1885  ;;  %1905 = vpow2.f32 %v1557_v52 }
 0x158   : > { %v1888_v7 = vpop.eup %1887  ;;  %1907 = vrcp.f32 %v897_v2  ;;  %v898_v28 = vadd.f32 1.0, %v1886_v25 }
 0x159   : > { %v1890_v8 = vpop.eup %1889  ;;  %1909 = vpow2.f32 %v1558_v61  ;;  %v733_v10 = vpop.f32.mrb[24].mxu1  ;;  %v910_v17 = vadd.f32 1.0, %v1888_v7  ;;  %v1563_v61 = vmul.f32 -1.442695, %v2414_v36 }
 0x15a   : > { %v2450_v31 = vpop.eup %1891  ;;  %1911 = vrcp.f32 %v898_v28  ;;  %v899_v11 = vadd.f32 1.0, %v1890_v8  ;;  %v735_v14 = vpop.f32.mrb[25].mxu1 }
 0x15b   : > { %v1894_v15 = vpop.eup %1893  ;;  %1913 = vpow2.f32 %v1559_v6  ;;  %v737_v18 = vpop.f32.mrb[26].mxu1 }
 0x15c   : > { %v2452_v34 = vpop.eup %1895  ;;  %1915 = vrcp.f32 %v899_v11  ;;  %v900_v19 = vadd.f32 1.0, %v1894_v15  ;;  %v739_v30 = vpop.f32.mrb[27].mxu1 }
 0x15d   : > { %v1898_v33 = vpop.eup %1897  ;;  %1917 = vpow2.f32 %v1560_v9 }
 0x15e   : > { %v1900_v40 = vpop.eup %1899  ;;  %1919 = vrcp.f32 %v900_v19  ;;  %v911_v7 = vadd.f32 1.0, %v1898_v33 }
 0x15f   : > { %v1902_v47 = vpop.eup %1901  ;;  %1921 = vrcp.f32 %v910_v17  ;;  %v991_v51 = vmul.f32 %v1900_v40, %v2374_v48 }
 0x160   : > { %v1904_v52 = vpop.eup %1903  ;;  %1923 = vpow2.f32 %v1545_v23  ;;  %v912_v19 = vadd.f32 1.0, %v1902_v47  ;;  %v1000_v47 = vmul.f32 %v2426_v22, %v2339_v26 }
 0x161   : > { %v1906_v55 = vpop.eup %1905  ;;  %v992_v45 = vmul.f32 %v1904_v52, %v2380_v56  ;;  %1925 = vpow2.f32 %v1561_v37  ;;  %v1023_v2 = vmul.f32 %v991_v51, %v729_v59  ;;  %v743_v25 = vpop.f32.mrb[28].mxu1 }
 0x162   : > { %v1908_v6 = vpop.eup %1907  ;;  %1927 = vpow2.f32 %v1546_v44  ;;  %v2462_v28 = vpop.f32.mrb[29].mxu1 }
 0x163   : > { %v1910_v48 = vpop.eup %1909  ;;  %v993_v8 = vmul.f32 %v1908_v6, %v2385_v60  ;;  %1929 = vpow2.f32 %v1562_v38  ;;  %v1051_v9 = vpack.c.bf16 %v1023_v2, %v2437_v41  ;;  %v1024_v11 = vmul.f32 %v992_v45, %v733_v10  ;;  %v2466_v15 = vpop.f32.mrb[30].mxu1 }
 0x164   : > { %v1912_v56 = vpop.eup %1911  ;;  %1931 = vpow2.f32 %v1547_v53  ;;  %v2468_v17 = vpop.f32.mrb[31].mxu1  ;;  %v913_v60 = vadd.f32 1.0, %v1906_v55  ;;  %v914_v51 = vadd.f32 1.0, %v1910_v48 }
 0x165   : > { %v1914_v59 = vpop.eup %1913  ;;  %v994_v23 = vmul.f32 %v1912_v56, %v2389_v63  ;;  %1933 = vpow2.f32 %v1563_v61  ;;  %1232 = vmatprep.mubr.bf16.mxu0 %v1051_v9  ;;  %v1025_v33 = vmul.f32 %v993_v8, %v735_v14  ;;  %v1001_v63 = vmul.f32 %v2431_v43, %v2344_v29 }
 0x166   : > { %v1916_v37 = vpop.eup %1915  ;;  %1935 = vrcp.f32 %v911_v7  ;;  %1233 = vmatmul.mubr.bf16.gmra.mrb[20].mxu0 %v1050_v3  ;;  %v1002_v14 = vmul.f32 %v2439_v54, %v2349_v32  ;;  %v915_v26 = vadd.f32 1.0, %v1914_v59  ;;  %v1004_v56 = vmul.f32 %v2450_v31, %v2360_v39 }
 0x167   : > { %v1918_v41 = vpop.eup %1917  ;;  %v995_v10 = vmul.f32 %v1916_v37, %v2394_v4  ;;  %v1026_v40 = vmul.f32 %v994_v23, %v737_v18  ;;  %1937 = vrcp.f32 %v912_v19  ;;  %v1003_v18 = vmul.f32 %v2444_v0, %v2354_v35 }
 0x168   : > { %v1920_v44 = vpop.eup %1919  ;;  %1939 = vrcp.f32 %v913_v60  ;;  %v916_v48 = vadd.f32 1.0, %v1918_v41  ;;  %v1005_v19 = vmul.f32 %v2452_v34, %v2365_v42 }
 0x169   : > { %v1922_v38 = vpop.eup %1921  ;;  %v996_v50 = vmul.f32 %v1920_v44, %v2398_v12  ;;  %v1052_v58 = vpack.c.bf16 %v1026_v40, %v1024_v11  ;;  %v1027_v3 = vmul.f32 %v995_v10, %v739_v30  ;;  %v753_v52 = vpop.f32.mrb[32].mxu1  ;;  %1941 = vrcp.f32 %v914_v51 }
 0x16a   : > { %v1924_v4 = vpop.eup %1923  ;;  %v2484_v22 = vmul.f32 %v1000_v47, %v753_v52  ;;  %v755_v29 = vpop.f32.mrb[33].mxu1  ;;  %v1006_v37 = vmul.f32 %v1922_v38, %v2371_v46 }
 0x16b   : > { %v1926_v43 = vpop.eup %1925  ;;  %v901_v53 = vadd.f32 1.0, %v1924_v4  ;;  %v1053_v32 = vpack.c.bf16 %v1027_v3, %v1025_v33  ;;  %v2486_v54 = vmul.f32 %v996_v50, %v743_v25  ;;  %v2488_v55 = vmul.f32 %v1001_v63, %v755_v29  ;;  %v757_v12 = vpop.f32.mrb[34].mxu1 }
 0x16c   : > { %v1928_v45 = vpop.eup %1927  ;;  %v2490_v30 = vmul.f32 %v1002_v14, %v757_v12  ;;  %v759_v61 = vpop.f32.mrb[35].mxu1  ;;  %v917_v59 = vadd.f32 1.0, %v1926_v43 }
 0x16d   : > { %v1930_v2 = vpop.eup %1929  ;;  %1943 = vrcp.f32 %v901_v53  ;;  %v902_v35 = vadd.f32 1.0, %v1928_v45  ;;  %1240 = vmatprep.mubr.bf16.mxu0 %v1053_v32  ;;  %v2492_v0 = vmul.f32 %v1003_v18, %v759_v61 }
 0x16e   : > { %v1932_v6 = vpop.eup %1931  ;;  %1945 = vrcp.f32 %v915_v26  ;;  %1241 = vmatmul.mubr.bf16.gmra.mrb[24].mxu0 %v1052_v58  ;;  %v1056_v25 = vpack.c.bf16 %v2490_v30, %v2484_v22  ;;  %v918_v23 = vadd.f32 1.0, %v1930_v2 }
 0x16f   : > { %v1934_v7 = vpop.eup %1933  ;;  %1947 = vrcp.f32 %v902_v35  ;;  %v903_v8 = vadd.f32 1.0, %v1932_v6  ;;  %v1057_v9 = vpack.c.bf16 %v2492_v0, %v2488_v55 }
 0x170   : > { %v1936_v11 = vpop.eup %1935  ;;  %v919_v60 = vadd.f32 1.0, %v1934_v7 }
 0x171   : > { %1949 = vrcp.f32 %v903_v8  ;;  %v763_v33 = vpop.f32.mrb[36].mxu1  ;;  %v1938_v40 = vpop.eup %1937  ;;  %v1007_v44 = vmul.f32 %v1936_v11, %v2376_v49 }
 0x172   : > { %v2503_v41 = vmul.f32 %v1004_v56, %v763_v33  ;;  %v765_v10 = vpop.f32.mrb[37].mxu1  ;;  %1951 = vrcp.f32 %v916_v48  ;;  %v1940_v39 = vpop.eup %1939  ;;  %v1008_v58 = vmul.f32 %v1938_v40, %v2382_v57 }
 0x173   : > { %v1037_v47 = vmul.f32 %v1005_v19, %v765_v10  ;;  %v767_v63 = vpop.f32.mrb[38].mxu1  ;;  %1953 = vrcp.f32 %v917_v59  ;;  %v1942_v34 = vpop.eup %1941  ;;  %v1009_v52 = vmul.f32 %v1940_v39, %v2387_v62 }
 0x174   : > { %v1038_v31 = vmul.f32 %v1006_v37, %v767_v63  ;;  %v769_v14 = vpop.f32.mrb[39].mxu1  ;;  %1955 = vrcp.f32 %v918_v23  ;;  %v1010_v18 = vmul.f32 %v1942_v34, %v2391_v1 }
 0x175   : > { %v1039_v42 = vmul.f32 %v1007_v44, %v769_v14  ;;  %1957 = vrcp.f32 %v919_v60 }
 0x176   : > { %v1058_v46 = vpack.c.bf16 %v1038_v31, %v2503_v41 }
 0x177   : > { %v1944_v51 = vpop.eup %1943  ;;  %v1059_v38 = vpack.c.bf16 %v1039_v42, %v1037_v47 }
 0x178   : > { %v1946_v50 = vpop.eup %1945  ;;  %v997_v49 = vmul.f32 %v1944_v51, %v2402_v16 }
 0x179   : > { %v1948_v3 = vpop.eup %1947  ;;  %v773_v4 = vpop.f32.mrb[40].mxu1  ;;  %v1011_v12 = vmul.f32 %v1946_v50, %v2396_v5 }
 0x17a   : > { %v998_v26 = vmul.f32 %v1948_v3, %v2407_v21  ;;  %v1029_v29 = vmul.f32 %v997_v49, %v2462_v28  ;;  %v1040_v43 = vmul.f32 %v1008_v58, %v773_v4  ;;  %v775_v53 = vpop.f32.mrb[41].mxu1 }
 0x17b   : > { %v1950_v32 = vpop.eup %1949  ;;  %v1041_v45 = vmul.f32 %v1009_v52, %v775_v53  ;;  %v777_v61 = vpop.f32.mrb[42].mxu1 }
 0x17c   : > { %v999_v57 = vmul.f32 %v1950_v32, %v2411_v27  ;;  %v1030_v16 = vmul.f32 %v998_v26, %v2466_v15  ;;  %v1042_v2 = vmul.f32 %v1010_v18, %v777_v61  ;;  %v779_v62 = vpop.f32.mrb[43].mxu1  ;;  %v1952_v35 = vpop.eup %1951 }
 0x17d   : > { %v1043_v6 = vmul.f32 %v1011_v12, %v779_v62  ;;  %v1954_v1 = vpop.eup %1953  ;;  %v1012_v5 = vmul.f32 %v1952_v35, %v2400_v13 }
 0x17e   : > { %v1054_v21 = vpack.c.bf16 %v1030_v16, %v2486_v54  ;;  %v1031_v28 = vmul.f32 %v999_v57, %v2468_v17  ;;  %v1060_v7 = vpack.c.bf16 %v1042_v2, %v1040_v43  ;;  %v1956_v48 = vpop.eup %1955  ;;  %v1013_v27 = vmul.f32 %v1954_v1, %v2405_v20 }
 0x17f   : > { %v1061_v8 = vpack.c.bf16 %v1043_v6, %v1041_v45  ;;  %v1958_v11 = vpop.eup %1957  ;;  %v1014_v15 = vmul.f32 %v1956_v48, %v2409_v24 }
 0x180   : > { %v1055_v56 = vpack.c.bf16 %v1031_v28, %v1029_v29  ;;  %v1015_v33 = vmul.f32 %v1958_v11, %v2414_v36 }
 0x181   : > { %v783_v59 = vpop.f32.mrb[44].mxu1 }
 0x182   : > { %1248 = vmatprep.mubr.bf16.mxu0 %v1055_v56  ;;  %v1044_v19 = vmul.f32 %v1012_v5, %v783_v59  ;;  %v785_v23 = vpop.f32.mrb[45].mxu1 }
 0x183   : > { %1249 = vmatmul.mubr.bf16.gmra.mrb[28].mxu0 %v1054_v21  ;;  %v1045_v54 = vmul.f32 %v1013_v27, %v785_v23  ;;  %v787_v17 = vpop.f32.mrb[46].mxu1 }
 0x184   : > { %1256 = vmatprep.mubr.bf16.mxu0 %v1057_v9  ;;  %v1046_v37 = vmul.f32 %v1014_v15, %v787_v17  ;;  %v789_v13 = vpop.f32.mrb[47].mxu1 }
 0x185   : > { %v1047_v60 = vmul.f32 %v1015_v33, %v789_v13 }
 0x186   : > { %v1062_v41 = vpack.c.bf16 %v1046_v37, %v1044_v19 }
 0x187   : > { %v1063_v20 = vpack.c.bf16 %v1047_v60, %v1045_v54 }
 0x18b   : > { %1257 = vmatmul.mubr.bf16.gmra.mrb[32].mxu0 %v1056_v25 }
 0x18c   : > { %1264 = vmatprep.mubr.bf16.mxu0 %v1059_v38 }
 0x193   : > { %1265 = vmatmul.mubr.bf16.gmra.mrb[36].mxu0 %v1058_v46 }
 0x194   : > { %1272 = vmatprep.mubr.bf16.mxu0 %v1061_v8 }
 0x19b   : > { %1273 = vmatmul.mubr.bf16.gmra.mrb[40].mxu0 %v1060_v7 }
 0x19c   : > { %1280 = vmatprep.mubr.bf16.mxu0 %v1063_v20 }
 0x1a3   : > { %1281 = vmatmul.mubr.bf16.gmra.mrb[44].mxu0 %v1062_v41 }
 0x225   : > { %v1605_v24 = vpop.f32.mrb[16].mxu0 }
 0x226   : > { %v1606_v36 = vpop.f32.mrb[17].mxu0 }
 0x227   : > { %v2528_v10 = vadd.f32 %v1606_v36, %v1605_v24  ;;  %v1608_v55 = vpop.f32.mrb[18].mxu0 }
 0x228   : > { %v1609_v0 = vpop.f32.mrb[19].mxu0 }
 0x229   : > { %v2530_v9 = vadd.f32 %v1609_v0, %v1608_v55  ;;  %1293 = vst [vmem:[%s2561_s9] sm:$0xff] (!%p1580_p5), %v2528_v10 }
 0x22b   : > { %1294 = vst [vmem:[%s2561_s9 + $0x8] sm:$0xff] (!%p1580_p5), %v2530_v9 }
 0x239   : > { %v1611_v40 = vpop.f32.mrb[20].mxu0 }
 0x23a   : > { %v1612_v44 = vpop.f32.mrb[21].mxu0 }
 0x23b   : > { %v2532_v47 = vadd.f32 %v1612_v44, %v1611_v40  ;;  %v1614_v22 = vpop.f32.mrb[22].mxu0 }
 0x23c   : > { %v1615_v30 = vpop.f32.mrb[23].mxu0 }
 0x23d   : > { %v2534_v25 = vadd.f32 %v1615_v30, %v1614_v22  ;;  %1295 = vst [vmem:[%s2561_s9 + $0x10] sm:$0xff] (!%p1580_p5), %v2532_v47 }
 0x23f   : > { %1296 = vst [vmem:[%s2561_s9 + $0x18] sm:$0xff] (!%p1580_p5), %v2534_v25 }
 0x241   : > { %v1617_v63 = vpop.f32.mrb[24].mxu0 }
 0x242   : > { %v1618_v39 = vpop.f32.mrb[25].mxu0 }
 0x243   : > { %v2536_v31 = vadd.f32 %v1618_v39, %v1617_v63  ;;  %v1620_v14 = vpop.f32.mrb[26].mxu0 }
 0x244   : > { %v1621_v42 = vpop.f32.mrb[27].mxu0 }
 0x245   : > { %v2538_v34 = vadd.f32 %v1621_v42, %v1620_v14  ;;  %1297 = vst [vmem:[%s2561_s9 + $0x20] sm:$0xff] (!%p1580_p5), %v2536_v31 }
 0x247   : > { %1298 = vst [vmem:[%s2561_s9 + $0x28] sm:$0xff] (!%p1580_p5), %v2538_v34 }
 0x256   : > { %v1623_v46 = vpop.f32.mrb[28].mxu0 }
 0x257   : > { %v1624_v51 = vpop.f32.mrb[29].mxu0 }
 0x258   : > { %v2540_v38 = vadd.f32 %v1624_v51, %v1623_v46  ;;  %v1626_v50 = vpop.f32.mrb[30].mxu0 }
 0x259   : > { %v1627_v58 = vpop.f32.mrb[31].mxu0 }
 0x25a   : > { %v2542_v49 = vadd.f32 %v1627_v58, %v1626_v50  ;;  %1299 = vst [vmem:[%s2561_s9 + $0x30] sm:$0xff] (!%p1580_p5), %v2540_v38 }
 0x25c   : > { %1300 = vst [vmem:[%s2561_s9 + $0x38] sm:$0xff] (!%p1580_p5), %v2542_v49 }
 0x25e   : > { %v1629_v3 = vpop.f32.mrb[32].mxu0 }
 0x25f   : > { %v1630_v52 = vpop.f32.mrb[33].mxu0 }
 0x260   : > { %v2544_v4 = vadd.f32 %v1630_v52, %v1629_v3  ;;  %v1632_v18 = vpop.f32.mrb[34].mxu0 }
 0x261   : > { %v1633_v26 = vpop.f32.mrb[35].mxu0 }
 0x262   : > { %v2546_v29 = vadd.f32 %v1633_v26, %v1632_v18  ;;  %1301 = vst [vmem:[%s2561_s9 + $0x40] sm:$0xff] (!%p1580_p5), %v2544_v4 }
 0x264   : > { %1302 = vst [vmem:[%s2561_s9 + $0x48] sm:$0xff] (!%p1580_p5), %v2546_v29 }
 0x266   : > { %v1635_v43 = vpop.f32.mrb[36].mxu0 }
 0x267   : > { %v1636_v53 = vpop.f32.mrb[37].mxu0 }
 0x268   : > { %v2548_v32 = vadd.f32 %v1636_v53, %v1635_v43  ;;  %v1638_v12 = vpop.f32.mrb[38].mxu0 }
 0x269   : > { %v1639_v45 = vpop.f32.mrb[39].mxu0 }
 0x26a   : > { %v2550_v61 = vadd.f32 %v1639_v45, %v1638_v12  ;;  %1303 = vst [vmem:[%s2561_s9 + $0x50] sm:$0xff] (!%p1580_p5), %v2548_v32 }
 0x26c   : > { %1304 = vst [vmem:[%s2561_s9 + $0x58] sm:$0xff] (!%p1580_p5), %v2550_v61 }
 0x26e   : > { %v1641_v57 = vpop.f32.mrb[40].mxu0 }
 0x26f   : > { %v1642_v16 = vpop.f32.mrb[41].mxu0 }
 0x270   : > { %v2552_v2 = vadd.f32 %v1642_v16, %v1641_v57  ;;  %v1644_v62 = vpop.f32.mrb[42].mxu0 }
 0x271   : > { %v1645_v35 = vpop.f32.mrb[43].mxu0 }
 0x272   : > { %v2554_v6 = vadd.f32 %v1645_v35, %v1644_v62  ;;  %1305 = vst [vmem:[%s2561_s9 + $0x60] sm:$0xff] (!%p1580_p5), %v2552_v2 }
 0x274   : > { %1292 = sbr.rel (%p1580_p5) target bundleno = 637 (0x27d), region = 59  ;;  %1306 = vst [vmem:[%s2561_s9 + $0x68] sm:$0xff] (!%p1580_p5), %v2554_v6 }
 0x276   : > { %v1647_v1 = vpop.f32.mrb[44].mxu0 }
 0x277   : > { %v1648_v21 = vpop.f32.mrb[45].mxu0 }
 0x278   : > { %v2556_v28 = vadd.f32 %v1648_v21, %v1647_v1  ;;  %v1650_v7 = vpop.f32.mrb[46].mxu0 }
 0x279   : > { %v1651_v48 = vpop.f32.mrb[47].mxu0 }
 0x27a   : > { %v2558_v8 = vadd.f32 %v1651_v48, %v1650_v7  ;;  %1307 = vst [vmem:[%s2561_s9 + $0x70] sm:$0xff] (!%p1580_p5), %v2556_v28 }
 0x27c   : > { %1308 = vst [vmem:[%s2561_s9 + $0x78] sm:$0xff] %v2558_v8 }
 0x27d PF: > { %p1581_p6 = scmp.le.s32.totalorder %s2053_s17, 0 }
 0x27e   : > { %v1313_v11 = vld [vmem:[%s2561_s9] sm:$0xff] (!%p1581_p6)  ;;  %v1314_v5 = vld [vmem:[%s2561_s9 + $0x8] sm:$0xff] (!%p1581_p6)  ;;  %v1315_v56 = vld [vmem:[%s2561_s9 + $0x10] sm:$0xff] (!%p1581_p6) }
 0x27f   : > { %1312 = sbr.rel (%p1581_p6) target bundleno = 649 (0x289), region = 63  ;;  %v1329_v27 = vadd.f32 (!%p1581_p6), %v2528_v10, %v1313_v11  ;;  %v1330_v59 = vadd.f32 (!%p1581_p6), %v2530_v9, %v1314_v5  ;;  %v1331_v15 = vadd.f32 (!%p1581_p6), %v2532_v47, %v1315_v56  ;;  %v1316_v19 = vld [vmem:[%s2561_s9 + $0x18] sm:$0xff] (!%p1581_p6)  ;;  %v1317_v23 = vld [vmem:[%s2561_s9 + $0x20] sm:$0xff] (!%p1581_p6)  ;;  %v1318_v33 = vld [vmem:[%s2561_s9 + $0x28] sm:$0xff] (!%p1581_p6) }
 0x280   : > { %v1332_v54 = vadd.f32 (!%p1581_p6), %v2534_v25, %v1316_v19  ;;  %v1333_v17 = vadd.f32 (!%p1581_p6), %v2536_v31, %v1317_v23  ;;  %v1334_v37 = vadd.f32 (!%p1581_p6), %v2538_v34, %v1318_v33  ;;  %v1319_v13 = vld [vmem:[%s2561_s9 + $0x30] sm:$0xff] (!%p1581_p6)  ;;  %v1320_v60 = vld [vmem:[%s2561_s9 + $0x38] sm:$0xff] (!%p1581_p6)  ;;  %v1321_v41 = vld [vmem:[%s2561_s9 + $0x40] sm:$0xff] (!%p1581_p6) }
 0x281   : > { %1345 = vst [vmem:[%s2561_s9] sm:$0xff] (!%p1581_p6), %v1329_v27  ;;  %1346 = vst [vmem:[%s2561_s9 + $0x8] sm:$0xff] (!%p1581_p6), %v1330_v59  ;;  %v1335_v20 = vadd.f32 (!%p1581_p6), %v2540_v38, %v1319_v13  ;;  %v1336_v24 = vadd.f32 (!%p1581_p6), %v2542_v49, %v1320_v60  ;;  %v1337_v36 = vadd.f32 (!%p1581_p6), %v2544_v4, %v1321_v41  ;;  %v1322_v10 = vld [vmem:[%s2561_s9 + $0x48] sm:$0xff] (!%p1581_p6)  ;;  %v1323_v55 = vld [vmem:[%s2561_s9 + $0x50] sm:$0xff] (!%p1581_p6) }
 0x282   : > { %1347 = vst [vmem:[%s2561_s9 + $0x10] sm:$0xff] (!%p1581_p6), %v1331_v15  ;;  %v1324_v0 = vld [vmem:[%s2561_s9 + $0x58] sm:$0xff] (!%p1581_p6)  ;;  %1348 = vst [vmem:[%s2561_s9 + $0x18] sm:$0xff] (!%p1581_p6), %v1332_v54  ;;  %v1338_v9 = vadd.f32 (!%p1581_p6), %v2546_v29, %v1322_v10  ;;  %v1339_v40 = vadd.f32 (!%p1581_p6), %v2548_v32, %v1323_v55  ;;  %v1325_v47 = vld [vmem:[%s2561_s9 + $0x60] sm:$0xff] (!%p1581_p6) }
 0x283   : > { %1349 = vst [vmem:[%s2561_s9 + $0x20] sm:$0xff] (!%p1581_p6), %v1333_v17  ;;  %1350 = vst [vmem:[%s2561_s9 + $0x28] sm:$0xff] (!%p1581_p6), %v1334_v37  ;;  %v1340_v44 = vadd.f32 (!%p1581_p6), %v2550_v61, %v1324_v0  ;;  %v1326_v22 = vld [vmem:[%s2561_s9 + $0x68] sm:$0xff] (!%p1581_p6)  ;;  %v1327_v30 = vld [vmem:[%s2561_s9 + $0x70] sm:$0xff] (!%p1581_p6)  ;;  %v1341_v25 = vadd.f32 (!%p1581_p6), %v2552_v2, %v1325_v47 }
 0x284   : > { %1351 = vst [vmem:[%s2561_s9 + $0x30] sm:$0xff] (!%p1581_p6), %v1335_v20  ;;  %1352 = vst [vmem:[%s2561_s9 + $0x38] sm:$0xff] (!%p1581_p6), %v1336_v24  ;;  %v1342_v63 = vadd.f32 (!%p1581_p6), %v2554_v6, %v1326_v22  ;;  %v1343_v39 = vadd.f32 (!%p1581_p6), %v2556_v28, %v1327_v30  ;;  %v1328_v31 = vld [vmem:[%s2561_s9 + $0x78] sm:$0xff] (!%p1581_p6) }
 0x285   : > { %1353 = vst [vmem:[%s2561_s9 + $0x40] sm:$0xff] (!%p1581_p6), %v1337_v36  ;;  %1354 = vst [vmem:[%s2561_s9 + $0x48] sm:$0xff] (!%p1581_p6), %v1338_v9  ;;  %v1344_v14 = vadd.f32 (!%p1581_p6), %v2558_v8, %v1328_v31 }
 0x286   : > { %1355 = vst [vmem:[%s2561_s9 + $0x50] sm:$0xff] %v1339_v40  ;;  %1356 = vst [vmem:[%s2561_s9 + $0x58] sm:$0xff] %v1340_v44 }
 0x287   : > { %1357 = vst [vmem:[%s2561_s9 + $0x60] sm:$0xff] %v1341_v25  ;;  %1358 = vst [vmem:[%s2561_s9 + $0x68] sm:$0xff] %v1342_v63 }
 0x288   : > { %1359 = vst [vmem:[%s2561_s9 + $0x70] sm:$0xff] %v1343_v39  ;;  %1360 = vst [vmem:[%s2561_s9 + $0x78] sm:$0xff] %v1344_v14 }
 0x289 PF: > { %s1588_s17 = sshll.u32 %s2057_s18, 11  ;;  %s1375_s11 = sshll.u32 %s2561_s9, 4  ;;  %s2652_s11 = int_to_ptr.vmem [resolvable:$true] %s1375_s11 }
 0x28a   : > { %s2649_s10 = scalar_lea.hbm %s2717_s3, %s1588_s17  ;;  %s2656_s22 = scalar_lea.sflag [#allocation4], %s292_s28 }
 0x28b   : > { %s1959_s23 = scalar_lea.vmem %s2652_s11, 2048  ;;  %s2072_s18 = smov [#allocation3]  }
 0x28c   : > { %p1960_p7 = scmp.ne.s32.totalorder %s2652_s11, %s1959_s23  ;;  %s1963_s26 = sshll.u32 %s2072_s18, 4  ;;  %s1964_s26 = int_to_ptr.vmem [resolvable:$false] %s1963_s26 }
 0x28d   : > { %s1965_s27 = scalar_lea.vmem %s1964_s26, 4096  ;;  %p1966_p11 = scmp.lt.s32.totalorder %s2652_s11, %s1964_s26 }
 0x28e   : > { %p1961_p8 = pnand %p1960_p7, %p2174_p10  ;;  %p1967_p13 = scmp.lt.s32.totalorder %s1965_s27, %s1959_s23 }
 0x290   : > { %p1962_p9 = pneg %p1961_p8  ;;  %p1968_p0 = por %p1967_p13, %p1966_p11 }
 0x292   : > { %p1969_p1 = pnand %p1968_p0, %p1962_p9 }
 0x294   : > { %1972 = shalt.err (!%p1969_p1)
}
 0x295   : > { %s1973_s28 = scalar_lea.hbm %s2649_s10, 2048  ;;  %s1977_s9 = scalar_lea.hbm %s2717_s3, 4096 }
 0x296   : > { %p1974_p2 = scmp.ne.s32.totalorder %s2649_s10, %s1973_s28  ;;  %p1978_p5 = scmp.lt.u32.totalorder %s2649_s10, %s2717_s3 }
 0x297   : > { %p1979_p6 = scmp.lt.u32.totalorder %s1977_s9, %s1973_s28  ;;  %p1981_p8 = scmp.lt.u32.totalorder %s1973_s28, %s2649_s10 }
 0x298   : > { %p1975_p3 = pnand %p1974_p2, %p2174_p10 }
 0x299   : > { %p1980_p7 = por %p1979_p6, %p1978_p5 }
 0x29a   : > { %p1976_p4 = pneg %p1975_p3 }
 0x29b   : > { %p1982_p9 = por %p1981_p8, %p1980_p7 }
 0x29d   : > { %p1983_p11 = pnand %p1982_p9, %p1976_p4 }
 0x29f   : > { %1986 = shalt.err (!%p1983_p11)
}
 0x2a0   : > { %s2073_s15 = smov 128   ;;  %s2074_s23 = smov 8  }
 0x2a1   : > { %1669 = dma.vmem_to_hbm [thread:$0]  (%p2174_p10), %s2652_s11, 2048, %s2649_s10, %s2656_s22, %s2073_s15, %s2073_s15, %s2074_s23  }
 0x2a2 PF: > { %p1675_p13 = scmp.ge.s32.totalorder %s2069_s21, 2  ;;  %s1390_s18 = sand.u32 1, %s2033_s12  }
 0x2a3   : > { %s1391_s26 = scalar_lea.sflag [#allocation4], %s1390_s18 }
 0x2a4   : > { %p1672_p0 = pnand %p1675_p13, %p2181_p12 }
 0x2a6   : > { %2028 = dma.done.wait (!%p1672_p0), %s1391_s26, 2048  }
 0x2a7   : > { %2030 = vsyncadd (!%p1672_p0), %s1391_s26, 4294965248  ;;  %s16_s21 = sadd.s32 1, %s2069_s21   ;;  %s2721_s12 = smov %s2037_s13 }
 0x2a8   : > { %p13_p1 = scmp.ge.s32.totalorder %s16_s21, 6   ;;  %s2722_s13 = smov %s2041_s14 }
 0x2a9   : > { %s2723_s14 = smov %s2179_s6  ;;  %s2724_s15 = smov %s2049_s16 }
 0x2aa   : > { %s2725_s16 = smov %s2168_s30  ;;  %s2726_s17 = smov %s2061_s19 }
 0x2ab   : > { %s2727_s18 = smov %s2065_s20  ;;  %s2728_s19 = smov %s2731_s24 }
 0x2ac   : > { %s2729_s20 = smov %s2735_s25  ;;  %15 = sbr.rel (!%p13_p1) target bundleno = 6 (0x6), region = 109 }
 0x2b3   :  { %1396 = vsyncpa [#allocation4], 1 }
 0x2b4   :  { %1398 = vsyncpa [#allocation4 + $0x1], 1 }

</bundles_post_ra>
